<compile_context>
chip_gen: v6e
topology: v6e:2x2x1
jax: 0.10.0
libtpu: 0.0.40
codegen_flags: <defaults>
</compile_context>

<pallas_src>
import math

import jax
import jax.numpy as jnp
from jax.experimental import pallas as pl
from jax.experimental.pallas import tpu as pltpu

BN_EPS = 1e-5
# Conservative working-set budget: fits v5e's 16 MiB default scoped VMEM with
# double buffering, and leaves ample headroom on v6e/v7x.
VMEM_BUDGET = 8 * 1024 * 1024


def _round_up(x, m):
    return ((x + m - 1) // m) * m


def _choose_tiles(M, K, Cout, out_itemsize):
    """Pick (tm, tk): largest M tile (<=512) and contraction tile whose
    double-buffered footprint stays under VMEM_BUDGET. tk splits keep the
    patch-tile last dim a multiple of 128 (or tk == K)."""
    m_cap = max(8, _round_up(min(M, 512), 8))

    def footprint(tm, tk):
        # 2x bf16 patch tiles + 2x bf16 weight tiles + f32 acc + out (+ residual).
        return (2 * tm * tk * 2 + 2 * tk * Cout * 2
                + tm * Cout * 4 + 2 * tm * Cout * (out_itemsize + 2))

    for tm in (512, 256, 128, 64, 32, 16, 8):
        if tm > m_cap:
            continue
        tk = K
        while (footprint(tm, tk) > VMEM_BUDGET and tk % 2 == 0
               and (tk // 2) % 128 == 0):
            tk //= 2
        if footprint(tm, tk) <= VMEM_BUDGET:
            return tm, tk
    return 8, K


# ---------------------------------------------------------------------------
# Pallas kernels: fused (patches @ weight) + bias [+ residual] [+ ReLU]
# (BN scale is pre-folded into the weights.)
# ---------------------------------------------------------------------------
def _make_single_k_kernel(relu: bool, has_residual: bool):
    if has_residual:
        def kernel(p_ref, w_ref, b_ref, r_ref, o_ref):
            y = jnp.dot(p_ref[...], w_ref[...], preferred_element_type=jnp.float32)
            y = y + b_ref[...] + r_ref[...].astype(jnp.float32)
            if relu:
                y = jnp.maximum(y, 0.0)
            o_ref[...] = y.astype(o_ref.dtype)
    else:
        def kernel(p_ref, w_ref, b_ref, o_ref):
            y = jnp.dot(p_ref[...], w_ref[...], preferred_element_type=jnp.float32)
            y = y + b_ref[...]
            if relu:
                y = jnp.maximum(y, 0.0)
            o_ref[...] = y.astype(o_ref.dtype)
    return kernel


def _make_ktiled_kernel(relu: bool, has_residual: bool):
    def kernel(*refs):
        if has_residual:
            p_ref, w_ref, b_ref, r_ref, o_ref, acc_ref = refs
        else:
            p_ref, w_ref, b_ref, o_ref, acc_ref = refs
            r_ref = None
        k = pl.program_id(1)

        @pl.when(k == 0)
        def _():
            acc_ref[...] = jnp.zeros_like(acc_ref)

        acc_ref[...] += jnp.dot(p_ref[...], w_ref[...],
                                preferred_element_type=jnp.float32)

        @pl.when(k == pl.num_programs(1) - 1)
        def _():
            y = acc_ref[...] + b_ref[...]
            if has_residual:
                y = y + r_ref[...].astype(jnp.float32)
            if relu:
                y = jnp.maximum(y, 0.0)
            o_ref[...] = y.astype(o_ref.dtype)

    return kernel


def fused_conv_matmul(patches, w, bias, residual=None, relu=True,
                      out_dtype=jnp.bfloat16):
    """patches: (M, K) bf16; w: (K, Cout) bf16 (BN scale folded in);
    bias: (Cout,) f32; residual: optional (M, Cout). Returns (M, Cout) out_dtype."""
    M, K = patches.shape
    Cout = w.shape[1]
    out_itemsize = jnp.dtype(out_dtype).itemsize
    tm, tk = _choose_tiles(M, K, Cout, out_itemsize)
    n_m = pl.cdiv(M, tm)
    n_k = K // tk

    bias2 = bias.reshape(1, Cout).astype(jnp.float32)
    has_res = residual is not None

    flops = 2 * M * K * Cout
    bytes_accessed = int(M * K * 2 + K * Cout * 2 + Cout * 4
                         + M * Cout * out_itemsize
                         + (M * Cout * residual.dtype.itemsize if has_res else 0))
    cost = pl.CostEstimate(flops=flops, transcendentals=0,
                           bytes_accessed=bytes_accessed)

    if n_k == 1:
        in_specs = [
            pl.BlockSpec((tm, K), lambda i: (i, 0)),       # patch tile
            pl.BlockSpec((K, Cout), lambda i: (0, 0)),     # full folded weight
            pl.BlockSpec((1, Cout), lambda i: (0, 0)),     # folded BN bias
        ]
        args = [patches, w, bias2]
        if has_res:
            in_specs.append(pl.BlockSpec((tm, Cout), lambda i: (i, 0)))
            args.append(residual)
        return pl.pallas_call(
            _make_single_k_kernel(relu, has_res),
            out_shape=jax.ShapeDtypeStruct((M, Cout), out_dtype),
            grid=(n_m,),
            in_specs=in_specs,
            out_specs=pl.BlockSpec((tm, Cout), lambda i: (i, 0)),
            compiler_params=pltpu.CompilerParams(
                dimension_semantics=("parallel",)),
            cost_estimate=cost,
        )(*args)

    # K-tiled path (large K * Cout weights): accumulate in f32 VMEM scratch.
    in_specs = [
        pl.BlockSpec((tm, tk), lambda i, k: (i, k)),
        pl.BlockSpec((tk, Cout), lambda i, k: (k, 0)),
        pl.BlockSpec((1, Cout), lambda i, k: (0, 0)),
    ]
    args = [patches, w, bias2]
    if has_res:
        in_specs.append(pl.BlockSpec((tm, Cout), lambda i, k: (i, 0)))
        args.append(residual)
    return pl.pallas_call(
        _make_ktiled_kernel(relu, has_res),
        out_shape=jax.ShapeDtypeStruct((M, Cout), out_dtype),
        grid=(n_m, n_k),
        in_specs=in_specs,
        out_specs=pl.BlockSpec((tm, Cout), lambda i, k: (i, 0)),
        scratch_shapes=[pltpu.VMEM((tm, Cout), jnp.float32)],
        compiler_params=pltpu.CompilerParams(
            dimension_semantics=("parallel", "arbitrary")),
        cost_estimate=cost,
    )(*args)


# ---------------------------------------------------------------------------
# Glue: im2col patch extraction (static shapes/strides), NHWC, bf16
# ---------------------------------------------------------------------------
def im2col(x, kh, kw, stride, dilation, padding):
    N, H, W, C = x.shape
    if padding:
        x = jnp.pad(x, ((0, 0), (padding, padding), (padding, padding), (0, 0)))
    Hp, Wp = H + 2 * padding, W + 2 * padding
    Ho = (Hp - dilation * (kh - 1) - 1) // stride + 1
    Wo = (Wp - dilation * (kw - 1) - 1) // stride + 1
    if kh == 1 and kw == 1 and stride == 1 and padding == 0:
        return x.reshape(N * H * W, C), (N, H, W)
    cols = []
    for i in range(kh):
        for j in range(kw):
            hs, ws = i * dilation, j * dilation
            patch = x[:, hs:hs + (Ho - 1) * stride + 1:stride,
                         ws:ws + (Wo - 1) * stride + 1:stride, :]
            cols.append(patch)
    pat = jnp.concatenate(cols, axis=-1)          # (N, Ho, Wo, kh*kw*C)
    return pat.reshape(N * Ho * Wo, kh * kw * C), (N, Ho, Wo)


def conv_bn_act(x, cfg, relu=True, residual=None, out_dtype=jnp.bfloat16):
    """x: NHWC bf16. cfg: dict(w2 (K,Cout) bf16 scale-folded, bias (Cout,) f32,
    kh, kw, stride, dilation, padding)."""
    patches, (N, Ho, Wo) = im2col(x, cfg["kh"], cfg["kw"], cfg["stride"],
                                  cfg["dilation"], cfg["padding"])
    cout = cfg["w2"].shape[1]
    res2 = None if residual is None else residual.reshape(N * Ho * Wo, cout)
    out = fused_conv_matmul(patches, cfg["w2"], cfg["bias"],
                            residual=res2, relu=relu, out_dtype=out_dtype)
    return out.reshape(N, Ho, Wo, cout)


# ---------------------------------------------------------------------------
# Parameter construction (mirrors DRN.__init__ with BasicBlock, expansion=1)
# ---------------------------------------------------------------------------
def conv_weight(key, kh, kw, cin, cout):
    n = kh * kw * cout
    std = math.sqrt(2.0 / n)
    return std * jax.random.normal(key, (kh, kw, cin, cout), dtype=jnp.float32)


def bn_fold(c):
    gamma = jnp.ones((c,), jnp.float32)
    beta = jnp.zeros((c,), jnp.float32)
    run_mean = jnp.zeros((c,), jnp.float32)
    run_var = jnp.ones((c,), jnp.float32)
    scale = gamma / jnp.sqrt(run_var + BN_EPS)
    bias = beta - run_mean * scale
    return scale, bias


def conv_bn_cfg(key, ksize, cin, cout, stride=1, dilation=1, padding=0):
    w = conv_weight(key, ksize, ksize, cin, cout)
    scale, bias = bn_fold(cout)
    # Fold the BN scale into the (flattened) conv weights; cast to bf16 for MXU.
    w_folded = (w.reshape(ksize * ksize * cin, cout)
                * scale[None, :]).astype(jnp.bfloat16)
    return dict(w2=w_folded, bias=bias.astype(jnp.float32),
                kh=ksize, kw=ksize,
                stride=stride, dilation=dilation, padding=padding)


def make_conv_layers(key, inplanes, channels, convs, stride=1, dilation=1):
    layers = []
    for i in range(convs):
        key, k = jax.random.split(key)
        layers.append(conv_bn_cfg(k, 3, inplanes, channels,
                                  stride=stride if i == 0 else 1,
                                  dilation=dilation, padding=dilation))
        inplanes = channels
    return layers, inplanes, key


def make_res_layer(key, inplanes, planes, blocks, stride=1, dilation=1,
                   new_level=True, residual=True):
    # BasicBlock: conv3x3(dil0) BN ReLU -> conv3x3(dil1) BN -> (+residual) -> ReLU
    assert dilation == 1 or dilation % 2 == 0
    layers = []
    downsample = None
    if stride != 1 or inplanes != planes:  # expansion = 1
        key, k = jax.random.split(key)
        downsample = conv_bn_cfg(k, 1, inplanes, planes, stride=stride,
                                 dilation=1, padding=0)
    d = (1, 1) if dilation == 1 else ((dilation // 2 if new_level else dilation), dilation)
    key, k1 = jax.random.split(key)
    key, k2 = jax.random.split(key)
    layers.append(dict(
        conv1=conv_bn_cfg(k1, 3, inplanes, planes, stride=stride,
                          dilation=d[0], padding=d[0]),
        conv2=conv_bn_cfg(k2, 3, planes, planes, stride=1,
                          dilation=d[1], padding=d[1]),
        downsample=downsample, residual=residual))
    inplanes = planes
    for _ in range(1, blocks):
        key, k1 = jax.random.split(key)
        key, k2 = jax.random.split(key)
        layers.append(dict(
            conv1=conv_bn_cfg(k1, 3, inplanes, planes, stride=1,
                              dilation=dilation, padding=dilation),
            conv2=conv_bn_cfg(k2, 3, planes, planes, stride=1,
                              dilation=dilation, padding=dilation),
            downsample=None, residual=residual))
    return layers, inplanes, key


def build_drn_params(key, channels, layers, num_classes):
    params = {}
    inplanes = channels[0]
    key, k = jax.random.split(key)
    params["layer0"] = [conv_bn_cfg(k, 7, 3, channels[0], stride=1, dilation=1, padding=3)]
    params["layer1"], inplanes, key = make_conv_layers(key, inplanes, channels[0], layers[0], stride=1)
    params["layer2"], inplanes, key = make_conv_layers(key, inplanes, channels[1], layers[1], stride=2)
    params["layer3"], inplanes, key = make_res_layer(key, inplanes, channels[2], layers[2], stride=2)
    params["layer4"], inplanes, key = make_res_layer(key, inplanes, channels[3], layers[3], stride=2)
    params["layer5"], inplanes, key = make_res_layer(key, inplanes, channels[4], layers[4],
                                                     dilation=2, new_level=False)
    params["layer6"], inplanes, key = make_res_layer(key, inplanes, channels[5], layers[5],
                                                     dilation=4, new_level=False)
    params["layer7"], inplanes, key = make_conv_layers(key, inplanes, channels[6], layers[6], dilation=2)
    params["layer8"], inplanes, key = make_conv_layers(key, inplanes, channels[7], layers[7], dilation=1)
    key, kw_ = jax.random.split(key)
    key, kb_ = jax.random.split(key)
    fan_in = channels[7]
    bound = 1.0 / math.sqrt(fan_in)
    params["fc"] = dict(
        w2=conv_weight(kw_, 1, 1, channels[7], num_classes)
            .reshape(channels[7], num_classes).astype(jnp.bfloat16),
        bias=jax.random.uniform(kb_, (num_classes,), jnp.float32, -bound, bound),
        kh=1, kw=1, stride=1, dilation=1, padding=0)
    return params


# ---------------------------------------------------------------------------
# Forward pass
# ---------------------------------------------------------------------------
def basic_block_forward(x, bp):
    out = conv_bn_act(x, bp["conv1"], relu=True)
    if bp["downsample"] is not None:
        res = conv_bn_act(x, bp["downsample"], relu=False)
    else:
        res = x
    if bp["residual"]:
        out = conv_bn_act(out, bp["conv2"], relu=True, residual=res)
    else:
        out = conv_bn_act(out, bp["conv2"], relu=True)
    return out


def drn_forward(x_nchw, params):
    # NCHW -> NHWC, bf16 activations internally.
    x = jnp.transpose(x_nchw, (0, 2, 3, 1)).astype(jnp.bfloat16)
    for cfg in params["layer0"]:
        x = conv_bn_act(x, cfg, relu=True)
    for cfg in params["layer1"]:
        x = conv_bn_act(x, cfg, relu=True)
    for cfg in params["layer2"]:
        x = conv_bn_act(x, cfg, relu=True)
    for bp in params["layer3"]:
        x = basic_block_forward(x, bp)
    for bp in params["layer4"]:
        x = basic_block_forward(x, bp)
    for bp in params["layer5"]:
        x = basic_block_forward(x, bp)
    for bp in params["layer6"]:
        x = basic_block_forward(x, bp)
    for cfg in params["layer7"]:
        x = conv_bn_act(x, cfg, relu=True)
    for cfg in params["layer8"]:
        x = conv_bn_act(x, cfg, relu=True)
    x = conv_bn_act(x, params["fc"], relu=False, out_dtype=jnp.float32)  # 1x1 conv + bias
    return jnp.transpose(x, (0, 3, 1, 2))  # back to NCHW


if __name__ == "__main__":
    key = jax.random.PRNGKey(0)
    # Small DRN config: BasicBlock, one block per stage.
    channels = [4, 4, 8, 8, 16, 16, 16, 16]
    layers = [1, 1, 1, 1, 1, 1, 1, 1]
    num_classes = 10

    key, kp = jax.random.split(key)
    params = build_drn_params(kp, channels, layers, num_classes)

    key, kx = jax.random.split(key)
    x = jax.random.normal(kx, (2, 3, 32, 32), dtype=jnp.float32)  # NCHW like PyTorch

    out = drn_forward(x, params)
    out = jax.block_until_ready(out)

    # 32 -> 32 -> 32 -> 16 -> 8 -> 4 -> 4 -> 4 -> 4 -> 4 spatially.
    assert out.shape == (2, num_classes, 4, 4), out.shape
    assert out.dtype == jnp.float32
    assert jnp.all(jnp.isfinite(out))
    print("KERNEL_OK")
</pallas_src>

<mosaic_0001>
module attributes {stable_mosaic.version = 11 : i64} {
  func.func @kernel(%arg0: i32, %arg1: memref<512x147xbf16, #tpu.memory_space<vmem>>, %arg2: memref<147x4xbf16, #tpu.memory_space<vmem>>, %arg3: memref<1x4xf32, #tpu.memory_space<vmem>>, %arg4: memref<512x4xbf16, #tpu.memory_space<vmem>>) attributes {dimension_semantics = [#tpu.dimension_semantics<parallel>], iteration_bounds = array<i64: 4>, scalar_prefetch = 0 : i64, scratch_operands = 0 : i64, tpu.core_type = #tpu.core_type<tc>, window_params = [{transform_indices = @transform_0, window_bounds = array<i64: 512, 147>}, {pipeline_mode = #tpu.pipeline_mode<synchronous>, transform_indices = @transform_1, window_bounds = array<i64: 147, 4>}, {pipeline_mode = #tpu.pipeline_mode<synchronous>, transform_indices = @transform_2, window_bounds = array<i64: 1, 4>}, {transform_indices = @transform_3, window_bounds = array<i64: 512, 4>}]} {
    %c0 = arith.constant 0 : index
    %c0_0 = arith.constant 0 : index
    %0 = vector.load %arg1[%c0, %c0_0] : memref<512x147xbf16, #tpu.memory_space<vmem>>, vector<512x147xbf16>
    %c0_1 = arith.constant 0 : index
    %c0_2 = arith.constant 0 : index
    %1 = vector.load %arg2[%c0_1, %c0_2] : memref<147x4xbf16, #tpu.memory_space<vmem>>, vector<147x4xbf16>
    %cst = arith.constant dense<0.000000e+00> : vector<512x4xf32>
    %2 = tpu.matmul %0, %1, %cst {dimension_numbers = #tpu.dot_dimension_numbers<[1], [0], [0], [1], [0, 0, 1, 1], [], []>} : vector<512x147xbf16>, vector<147x4xbf16>, vector<512x4xf32> -> vector<512x4xf32>
    %c0_3 = arith.constant 0 : index
    %c0_4 = arith.constant 0 : index
    %3 = vector.load %arg3[%c0_3, %c0_4] : memref<1x4xf32, #tpu.memory_space<vmem>>, vector<1x4xf32>
    %4 = vector.broadcast %3 : vector<1x4xf32> to vector<512x4xf32>
    %5 = arith.addf %2, %4 : vector<512x4xf32>
    %cst_5 = arith.constant 0.000000e+00 : f32
    %6 = vector.broadcast %cst_5 : f32 to vector<512x4xf32>
    %7 = arith.maximumf %5, %6 : vector<512x4xf32>
    %8 = arith.truncf %7 : vector<512x4xf32> to vector<512x4xbf16>
    %c0_6 = arith.constant 0 : index
    %c0_7 = arith.constant 0 : index
    %9 = vector.load %arg4[%c0_6, %c0_7] : memref<512x4xbf16, #tpu.memory_space<vmem>>, vector<512x4xbf16>
    tpu.vector_store %arg4[%c0_6, %c0_7], %8 {strides = array<i32>} : memref<512x4xbf16, #tpu.memory_space<vmem>>, vector<512x4xbf16>,
    return
  }
  func.func @transform_0(%arg0: i32) -> (i32, i32) {
    %c0_i32 = arith.constant 0 : i32
    %c0_i32_0 = arith.constant 0 : i32
    return %arg0, %c0_i32 : i32, i32
  }
  func.func @transform_1(%arg0: i32) -> (i32, i32) {
    %c0_i32 = arith.constant 0 : i32
    %c0_i32_0 = arith.constant 0 : i32
    %c0_i32_1 = arith.constant 0 : i32
    return %c0_i32, %c0_i32_0 : i32, i32
  }
  func.func @transform_2(%arg0: i32) -> (i32, i32) {
    %c0_i32 = arith.constant 0 : i32
    %c0_i32_0 = arith.constant 0 : i32
    %c0_i32_1 = arith.constant 0 : i32
    return %c0_i32, %c0_i32_0 : i32, i32
  }
  func.func @transform_3(%arg0: i32) -> (i32, i32) {
    %c0_i32 = arith.constant 0 : i32
    %c0_i32_0 = arith.constant 0 : i32
    return %arg0, %c0_i32 : i32, i32
  }
}

</mosaic_0001>

<bundles_post_ra>
// kernel: tpu_custom_call.1
= control target key start
LH: loop header
LB: loop body
LE: loop exit
PB: predicated region body
PF: predicated region fallthrough
CT: control target
= control target key end

     0   :  { %s1861_s12 = smov 0   ;;  %s2209_s0 = inlined_call_operand.vmem [shape: bf16[2048,147], index: 0, kind: input, shape index: {}]   ;;  %s2210_s1 = inlined_call_operand.vmem [shape: bf16[147,4], index: 1, kind: input, shape index: {}]   ;;  %s2211_s2 = inlined_call_operand.vmem [shape: f32[1,4], index: 2, kind: input, shape index: {}]   ;;  %s2212_s3 = inlined_call_operand.vmem [shape: bf16[2048,4], index: 3, kind: output, shape index: {}]  }
   0x1 LB: > { %s1447_s13 = sadd.s32 4294967295, %s1837_s12   ;;  %p1451_p0 = scmp.ge.s32.totalorder %s1837_s12, 1  ;;  %s1837_s12 = sphi %s1861_s12, %s13_s12  }
   0x2   : > { %p139_p1 = scmp.lt.s32.totalorder %s1837_s12, 5 }
   0x4   : > { %p140_p2 = pnand %p1451_p0, %p139_p1 }
   0x5   : > { %s1452_s20 = sshll.u32 (!%p140_p2), %s1447_s13, 6 }
   0x6   : > { %143 = sbr.rel (%p140_p2) target bundleno = 376 (0x178), region = 32  ;;  %p165_p3 = scmp.lt.s32.totalorder (!%p140_p2), %s1452_s20, 255 }
   0xb   : > { %v1725_v0 = vld [vmem:[%s2210_s1 + $0x38] sm:$0xff]   ;;  %v1839_v1 = vmov 0   ;;  %v1726_v2 = vld [vmem:[%s2210_s1 + $0x30] sm:$0xff]   ;;  %v1727_v3 = vld [vmem:[%s2210_s1 + $0x28] sm:$0xff]   ;;  %s2214_s20 = smov (!%p165_p3, %s1452_s20), 255  ;;  %vm613_vm0 = vcmask 154624  }
   0xc   : > { %717 = vmatprep.subr.bf16.mxu0 %v1839_v1  ;;  %1695 = vmatprep.subr.bf16.mxu1 %v1839_v1  ;;  %v1728_v4 = vld [vmem:[%s2210_s1 + $0x20] sm:$0xff]   ;;  %s1630_s23 = sshll.u32 %s2214_s20, 3  ;;  %v1729_v5 = vld [vmem:[%s2210_s1 + $0x18] sm:$0xff]   ;;  %v1730_v8 = vld [vmem:[%s2210_s1 + $0x10] sm:$0xff]   ;;  %vm710_vm1 = vcmask 1040384   ;;  %vm711_vm2 = vcmask 1041408  }
   0xd   : > { %718 = vmatpush1.bf16.msra.mxu0 %v1725_v0  ;;  %1705 = vmatpush1.bf16.msra.mxu1 %v1725_v0  ;;  %s1887_s26 = scalar_lea.vmem %s2209_s0, %s1630_s23  ;;  %v1731_v9 = vld [vmem:[%s2210_s1 + $0x8] sm:$0xff]   ;;  %v1840_v10 = vmov 65535   ;;  %v1732_v12 = vld [vmem:[%s2210_s1] sm:$0xff]   ;;  %s1456_s15 = sshll.u32 %s2214_s20, 2  ;;  %vm1326_vm3 = vcmask 27648  }
   0xe   : > { %719 = vmatprep.subr.bf16.mxu0 %v1839_v1  ;;  %1696 = vmatprep.subr.bf16.mxu1 %v1839_v1  ;;  %v1737_v6 = vld [vmem:[%s1887_s26 + $0x4] ss:$8 sps:$4 sm:$0xff]   ;;  %v712_v11 = vsel %vm710_vm1, 4294967295, %v1840_v10  ;;  %v1733_v13 = vld [vmem:[%s2210_s1 + $0x48] ss:$0 sps:$4 sm:$0x33]   ;;  %s2014_s18 = scalar_lea.vmem %s2212_s3, %s1456_s15 }
   0xf   : > { %v1740_v7 = vld [vmem:[%s1887_s26 + $0x104] ss:$8 sps:$4 sm:$0xff]   ;;  %1532 = vmatprep.mubr.msk.bf16.mxu0 %vm613_vm0, %v1737_v6  ;;  %v713_v14 = vsel %vm711_vm2, %v712_v11, 0  ;;  %v1735_v17 = vld [vmem:[%s1887_s26] ss:$8 sps:$4 sm:$0xff]  }
  0x10   : > { %1548 = vmatprep.mubr.msk.bf16.mxu1 %vm613_vm0, %v1740_v7  ;;  %v715_v15 = vand.u32 %v1733_v13, %v713_v14  ;;  %v1734_v16 = vld [vmem:[%s2210_s1 + $0x40] sm:$0xff]   ;;  %v1741_v19 = vld [vmem:[%s1887_s26 + $0x14] ss:$8 sps:$4 sm:$0xff]   ;;  %v1745_v21 = vld [vmem:[%s1887_s26 + $0x10] ss:$8 sps:$4 sm:$0xff]  }
  0x11   : > { %720 = vmatpush1.bf16.msra.mxu0 %v1726_v2  ;;  %1706 = vmatpush1.bf16.msra.mxu1 %v1726_v2  ;;  %v1738_v18 = vld [vmem:[%s1887_s26 + $0x100] ss:$8 sps:$4 sm:$0xff]   ;;  %v1743_v20 = vld [vmem:[%s1887_s26 + $0x114] ss:$8 sps:$4 sm:$0xff]   ;;  %v1746_v22 = vld [vmem:[%s1887_s26 + $0x110] ss:$8 sps:$4 sm:$0xff]  }
  0x12   : > { %721 = vmatprep.subr.bf16.mxu0 %v1839_v1  ;;  %1697 = vmatprep.subr.bf16.mxu1 %v1839_v1  ;;  %v1747_v23 = vld [vmem:[%s1887_s26 + $0x24] ss:$8 sps:$4 sm:$0xff]   ;;  %v1751_v25 = vld [vmem:[%s1887_s26 + $0x20] ss:$8 sps:$4 sm:$0xff]   ;;  %v1753_v27 = vld [vmem:[%s1887_s26 + $0x34] ss:$8 sps:$4 sm:$0xff]  }
  0x13   : > { %v1749_v24 = vld [vmem:[%s1887_s26 + $0x124] ss:$8 sps:$4 sm:$0xff]   ;;  %v1752_v26 = vld [vmem:[%s1887_s26 + $0x120] ss:$8 sps:$4 sm:$0xff]   ;;  %v1755_v28 = vld [vmem:[%s1887_s26 + $0x134] ss:$8 sps:$4 sm:$0xff]  }
  0x14   : > { %v1757_v29 = vld [vmem:[%s1887_s26 + $0x30] ss:$8 sps:$4 sm:$0xff]   ;;  %v1759_v31 = vld [vmem:[%s1887_s26 + $0x44] ss:$8 sps:$4 sm:$0xff]   ;;  %v1763_v33 = vld [vmem:[%s1887_s26 + $0x40] ss:$8 sps:$4 sm:$0xff]  }
  0x15   : > { %722 = vmatpush1.bf16.msra.mxu0 %v1727_v3  ;;  %1707 = vmatpush1.bf16.msra.mxu1 %v1727_v3  ;;  %v1758_v30 = vld [vmem:[%s1887_s26 + $0x130] ss:$8 sps:$4 sm:$0xff]   ;;  %v1761_v32 = vld [vmem:[%s1887_s26 + $0x144] ss:$8 sps:$4 sm:$0xff]   ;;  %v1764_v34 = vld [vmem:[%s1887_s26 + $0x140] ss:$8 sps:$4 sm:$0xff]  }
  0x16   : > { %723 = vmatprep.subr.bf16.mxu0 %v1839_v1  ;;  %1698 = vmatprep.subr.bf16.mxu1 %v1839_v1  ;;  %v1765_v35 = vld [vmem:[%s1887_s26 + $0x54] ss:$8 sps:$4 sm:$0xff]   ;;  %v1769_v37 = vld [vmem:[%s1887_s26 + $0x50] ss:$8 sps:$4 sm:$0xff]   ;;  %v1771_v39 = vld [vmem:[%s1887_s26 + $0x64] ss:$8 sps:$4 sm:$0xff]  }
  0x17   : > { %v1767_v36 = vld [vmem:[%s1887_s26 + $0x154] ss:$8 sps:$4 sm:$0xff]   ;;  %v1770_v38 = vld [vmem:[%s1887_s26 + $0x150] ss:$8 sps:$4 sm:$0xff]   ;;  %v1773_v40 = vld [vmem:[%s1887_s26 + $0x164] ss:$8 sps:$4 sm:$0xff]  }
  0x18   : > { %v1775_v41 = vld [vmem:[%s1887_s26 + $0x60] ss:$8 sps:$4 sm:$0xff]   ;;  %v1777_v43 = vld [vmem:[%s1887_s26 + $0x74] ss:$8 sps:$4 sm:$0xff]   ;;  %v1781_v45 = vld [vmem:[%s1887_s26 + $0x70] ss:$8 sps:$4 sm:$0xff]  }
  0x19   : > { %724 = vmatpush1.bf16.msra.mxu0 %v1728_v4  ;;  %1708 = vmatpush1.bf16.msra.mxu1 %v1728_v4  ;;  %v1776_v42 = vld [vmem:[%s1887_s26 + $0x160] ss:$8 sps:$4 sm:$0xff]   ;;  %v1779_v44 = vld [vmem:[%s1887_s26 + $0x174] ss:$8 sps:$4 sm:$0xff]   ;;  %v1782_v46 = vld [vmem:[%s1887_s26 + $0x170] ss:$8 sps:$4 sm:$0xff]  }
  0x1a   : > { %725 = vmatprep.subr.bf16.mxu0 %v1839_v1  ;;  %1699 = vmatprep.subr.bf16.mxu1 %v1839_v1  ;;  %v1783_v47 = vld [vmem:[%s1887_s26 + $0x84] ss:$8 sps:$4 sm:$0xff]   ;;  %v1787_v49 = vld [vmem:[%s1887_s26 + $0x80] ss:$8 sps:$4 sm:$0xff]   ;;  %v1789_v51 = vld [vmem:[%s1887_s26 + $0x94] ss:$8 sps:$4 sm:$0xff]  }
  0x1b   : > { %v1785_v48 = vld [vmem:[%s1887_s26 + $0x184] ss:$8 sps:$4 sm:$0xff]   ;;  %v1788_v50 = vld [vmem:[%s1887_s26 + $0x180] ss:$8 sps:$4 sm:$0xff]   ;;  %v1791_v52 = vld [vmem:[%s1887_s26 + $0x194] ss:$8 sps:$4 sm:$0xff]  }
  0x1c   : > { %v1793_v53 = vld [vmem:[%s1887_s26 + $0x90] ss:$8 sps:$4 sm:$0xff]   ;;  %v1795_v55 = vld [vmem:[%s1887_s26 + $0xa4] ss:$8 sps:$4 sm:$0xff]   ;;  %v1799_v57 = vld [vmem:[%s1887_s26 + $0xa0] ss:$8 sps:$4 sm:$0xff]  }
  0x1d   : > { %726 = vmatpush1.bf16.msra.mxu0 %v1729_v5  ;;  %1709 = vmatpush1.bf16.msra.mxu1 %v1729_v5  ;;  %v1794_v54 = vld [vmem:[%s1887_s26 + $0x190] ss:$8 sps:$4 sm:$0xff]   ;;  %v1797_v56 = vld [vmem:[%s1887_s26 + $0x1a4] ss:$8 sps:$4 sm:$0xff]   ;;  %v1800_v58 = vld [vmem:[%s1887_s26 + $0x1a0] ss:$8 sps:$4 sm:$0xff]  }
  0x1e   : > { %727 = vmatprep.subr.bf16.mxu0 %v1839_v1  ;;  %1700 = vmatprep.subr.bf16.mxu1 %v1839_v1  ;;  %v1801_v59 = vld [vmem:[%s1887_s26 + $0xb4] ss:$8 sps:$4 sm:$0xff]   ;;  %v1805_v61 = vld [vmem:[%s1887_s26 + $0xb0] ss:$8 sps:$4 sm:$0xff]   ;;  %v1807_v63 = vld [vmem:[%s1887_s26 + $0xc4] ss:$8 sps:$4 sm:$0xff]  }
  0x1f   : > { %v1803_v60 = vld [vmem:[%s1887_s26 + $0x1b4] ss:$8 sps:$4 sm:$0xff]   ;;  %v1806_v62 = vld [vmem:[%s1887_s26 + $0x1b0] ss:$8 sps:$4 sm:$0xff]   ;;  %v1809_v0 = vld [vmem:[%s1887_s26 + $0x1c4] ss:$8 sps:$4 sm:$0xff]  }
  0x20   : > { %v1812_v2 = vld [vmem:[%s1887_s26 + $0x1c0] ss:$8 sps:$4 sm:$0xff]   ;;  %v1813_v3 = vld [vmem:[%s1887_s26 + $0xd4] ss:$8 sps:$4 sm:$0xff]   ;;  %v1817_v5 = vld [vmem:[%s1887_s26 + $0xd0] ss:$8 sps:$4 sm:$0xff]  }
  0x21   : > { %728 = vmatpush1.bf16.msra.mxu0 %v1730_v8  ;;  %1710 = vmatpush1.bf16.msra.mxu1 %v1730_v8  ;;  %v1815_v4 = vld [vmem:[%s1887_s26 + $0x1d4] ss:$8 sps:$4 sm:$0xff]   ;;  %v1818_v6 = vld [vmem:[%s1887_s26 + $0x1d0] ss:$8 sps:$4 sm:$0xff]   ;;  %v1819_v7 = vld [vmem:[%s1887_s26 + $0xe4] ss:$8 sps:$4 sm:$0xff]  }
  0x22   : > { %729 = vmatprep.subr.bf16.mxu0 %v1839_v1  ;;  %1701 = vmatprep.subr.bf16.mxu1 %v1839_v1  ;;  %v1821_v8 = vld [vmem:[%s1887_s26 + $0x1e4] ss:$8 sps:$4 sm:$0xff]   ;;  %v1824_v10 = vld [vmem:[%s1887_s26 + $0x1e0] ss:$8 sps:$4 sm:$0xff]   ;;  %v1825_v11 = vld [vmem:[%s1887_s26 + $0xf4] ss:$8 sps:$4 sm:$0xff]  }
  0x23   : > { %v1829_v13 = vld [vmem:[%s1887_s26 + $0xf0] ss:$8 sps:$4 sm:$0xff]  }
  0x24   : > { %v1830_v14 = vld [vmem:[%s1887_s26 + $0x1f0] ss:$8 sps:$4 sm:$0xff]  }
  0x25   : > { %730 = vmatpush1.bf16.msra.mxu0 %v1731_v9  ;;  %1711 = vmatpush1.bf16.msra.mxu1 %v1731_v9  ;;  %v1823_v9 = vld [vmem:[%s1887_s26 + $0xe0] ss:$8 sps:$4 sm:$0xff]  }
  0x26   : > { %731 = vmatprep.subr.bf16.mxu0 %v1839_v1  ;;  %1702 = vmatprep.subr.bf16.mxu1 %v1839_v1 }
  0x29   : > { %732 = vmatpush1.bf16.msra.mxu0 %v1732_v12  ;;  %1712 = vmatpush1.bf16.msra.mxu1 %v1732_v12  ;;  %v1827_v12 = vld [vmem:[%s1887_s26 + $0x1f4] ss:$8 sps:$4 sm:$0xff]  }
  0x2a   : > { %745 = vmatprep.subr.bf16.mxu0 %v1839_v1  ;;  %1703 = vmatprep.subr.bf16.mxu1 %v1839_v1 }
  0x2d   : > { %746 = vmatpush2.bf16.msra.mxu0 %v715_v15  ;;  %1713 = vmatpush2.bf16.msra.mxu1 %v715_v15  ;;  %v2006_v15 = vld [vmem:[%s2211_s2] ss:$0 sm:$0xff] }
  0x2e   : > { %747 = vmatprep.subr.bf16.mxu0 %v1839_v1  ;;  %1704 = vmatprep.subr.bf16.mxu1 %v1839_v1  ;;  %v1811_v1 = vld [vmem:[%s1887_s26 + $0xc0] ss:$8 sps:$4 sm:$0xff]  }
  0x31   : > { %748 = vmatpush2.bf16.msra.mxu0 %v1734_v16  ;;  %1714 = vmatpush2.bf16.msra.mxu1 %v1734_v16 }
  0x34   : > { %750 = vmatmul.mubr.bf16.vlgmr.msra.gmra.mxu0 %v1735_v17  ;;  %878 = vmatmul.mubr.bf16.vlgmr.msra.gmra.mxu1 %v1738_v18 }
  0x35   : > { %1533 = vmatprep.mubr.msk.bf16.mxu0 %vm613_vm0, %v1741_v19  ;;  %1549 = vmatprep.mubr.msk.bf16.mxu1 %vm613_vm0, %v1743_v20 }
  0x3c   : > { %758 = vmatmul.mubr.bf16.gmra.mxu0 %v1745_v21  ;;  %886 = vmatmul.mubr.bf16.gmra.mxu1 %v1746_v22 }
  0x3d   : > { %1534 = vmatprep.mubr.msk.bf16.mxu0 %vm613_vm0, %v1747_v23  ;;  %1550 = vmatprep.mubr.msk.bf16.mxu1 %vm613_vm0, %v1749_v24 }
  0x44   : > { %766 = vmatmul.mubr.bf16.gmra.mxu0 %v1751_v25  ;;  %894 = vmatmul.mubr.bf16.gmra.mxu1 %v1752_v26 }
  0x45   : > { %1535 = vmatprep.mubr.msk.bf16.mxu0 %vm613_vm0, %v1753_v27  ;;  %1551 = vmatprep.mubr.msk.bf16.mxu1 %vm613_vm0, %v1755_v28 }
  0x4c   : > { %774 = vmatmul.mubr.bf16.gmra.mxu0 %v1757_v29  ;;  %902 = vmatmul.mubr.bf16.gmra.mxu1 %v1758_v30 }
  0x4d   : > { %1536 = vmatprep.mubr.msk.bf16.mxu0 %vm613_vm0, %v1759_v31  ;;  %1552 = vmatprep.mubr.msk.bf16.mxu1 %vm613_vm0, %v1761_v32 }
  0x54   : > { %782 = vmatmul.mubr.bf16.gmra.mxu0 %v1763_v33  ;;  %910 = vmatmul.mubr.bf16.gmra.mxu1 %v1764_v34 }
  0x55   : > { %1537 = vmatprep.mubr.msk.bf16.mxu0 %vm613_vm0, %v1765_v35  ;;  %1553 = vmatprep.mubr.msk.bf16.mxu1 %vm613_vm0, %v1767_v36 }
  0x5c   : > { %790 = vmatmul.mubr.bf16.gmra.mxu0 %v1769_v37  ;;  %918 = vmatmul.mubr.bf16.gmra.mxu1 %v1770_v38 }
  0x5d   : > { %1538 = vmatprep.mubr.msk.bf16.mxu0 %vm613_vm0, %v1771_v39  ;;  %1554 = vmatprep.mubr.msk.bf16.mxu1 %vm613_vm0, %v1773_v40 }
  0x64   : > { %798 = vmatmul.mubr.bf16.gmra.mxu0 %v1775_v41  ;;  %926 = vmatmul.mubr.bf16.gmra.mxu1 %v1776_v42 }
  0x65   : > { %1539 = vmatprep.mubr.msk.bf16.mxu0 %vm613_vm0, %v1777_v43  ;;  %1555 = vmatprep.mubr.msk.bf16.mxu1 %vm613_vm0, %v1779_v44 }
  0x6c   : > { %806 = vmatmul.mubr.bf16.gmra.mxu0 %v1781_v45  ;;  %934 = vmatmul.mubr.bf16.gmra.mxu1 %v1782_v46 }
  0x6d   : > { %1540 = vmatprep.mubr.msk.bf16.mxu0 %vm613_vm0, %v1783_v47  ;;  %1556 = vmatprep.mubr.msk.bf16.mxu1 %vm613_vm0, %v1785_v48 }
  0x74   : > { %814 = vmatmul.mubr.bf16.gmra.mxu0 %v1787_v49  ;;  %942 = vmatmul.mubr.bf16.gmra.mxu1 %v1788_v50 }
  0x75   : > { %1541 = vmatprep.mubr.msk.bf16.mxu0 %vm613_vm0, %v1789_v51  ;;  %1557 = vmatprep.mubr.msk.bf16.mxu1 %vm613_vm0, %v1791_v52 }
  0x7c   : > { %822 = vmatmul.mubr.bf16.gmra.mxu0 %v1793_v53  ;;  %950 = vmatmul.mubr.bf16.gmra.mxu1 %v1794_v54 }
  0x7d   : > { %1542 = vmatprep.mubr.msk.bf16.mxu0 %vm613_vm0, %v1795_v55  ;;  %1558 = vmatprep.mubr.msk.bf16.mxu1 %vm613_vm0, %v1797_v56 }
  0x84   : > { %830 = vmatmul.mubr.bf16.gmra.mxu0 %v1799_v57  ;;  %958 = vmatmul.mubr.bf16.gmra.mxu1 %v1800_v58 }
  0x85   : > { %1543 = vmatprep.mubr.msk.bf16.mxu0 %vm613_vm0, %v1801_v59  ;;  %1559 = vmatprep.mubr.msk.bf16.mxu1 %vm613_vm0, %v1803_v60 }
  0x8c   : > { %838 = vmatmul.mubr.bf16.gmra.mxu0 %v1805_v61  ;;  %966 = vmatmul.mubr.bf16.gmra.mxu1 %v1806_v62 }
  0x8d   : > { %1544 = vmatprep.mubr.msk.bf16.mxu0 %vm613_vm0, %v1807_v63  ;;  %1560 = vmatprep.mubr.msk.bf16.mxu1 %vm613_vm0, %v1809_v0 }
  0x94   : > { %846 = vmatmul.mubr.bf16.gmra.mxu0 %v1811_v1  ;;  %974 = vmatmul.mubr.bf16.gmra.mxu1 %v1812_v2 }
  0x95   : > { %1545 = vmatprep.mubr.msk.bf16.mxu0 %vm613_vm0, %v1813_v3  ;;  %1561 = vmatprep.mubr.msk.bf16.mxu1 %vm613_vm0, %v1815_v4 }
  0x9c   : > { %854 = vmatmul.mubr.bf16.gmra.mxu0 %v1817_v5  ;;  %982 = vmatmul.mubr.bf16.gmra.mxu1 %v1818_v6 }
  0x9d   : > { %1546 = vmatprep.mubr.msk.bf16.mxu0 %vm613_vm0, %v1819_v7  ;;  %1562 = vmatprep.mubr.msk.bf16.mxu1 %vm613_vm0, %v1821_v8 }
  0xa4   : > { %862 = vmatmul.mubr.bf16.gmra.mxu0 %v1823_v9  ;;  %990 = vmatmul.mubr.bf16.gmra.mxu1 %v1824_v10 }
  0xa5   : > { %1547 = vmatprep.mubr.msk.bf16.mxu0 %vm613_vm0, %v1825_v11  ;;  %1563 = vmatprep.mubr.msk.bf16.mxu1 %vm613_vm0, %v1827_v12 }
  0xac   : > { %870 = vmatmul.mubr.bf16.gmra.mxu0 %v1829_v13  ;;  %998 = vmatmul.mubr.bf16.gmra.mxu1 %v1830_v14 }
  0xf4   : > { %v751_v16 = vpop.f32.mrf.mxu0  ;;  %v879_v17 = vpop.f32.mrf.mxu1 }
  0xf5   : > { %v752_v18 = vadd.f32 %v2006_v15, %v751_v16  ;;  %v880_v19 = vadd.f32 %v2006_v15, %v879_v17 }
  0xf6   : > { %v753_v20 = vpop.f32.mrf.mxu0  ;;  %v881_v21 = vpop.f32.mrf.mxu1 }
  0xf7   : > { %v1006_v22 = vmax.f32 %v752_v18, 0.0  ;;  %v1038_v23 = vmax.f32 %v880_v19, 0.0 }
  0xf8   : > { %v754_v24 = vpop.f32.mrf.mxu0  ;;  %v882_v25 = vpop.f32.mrf.mxu1 }
  0xf9   : > { %v1631_v26 = vpack.c.bf16 %v1006_v22, %v1006_v22  ;;  %v1663_v27 = vpack.c.bf16 %v1038_v23, %v1038_v23  ;;  %v755_v28 = vadd.f32 %v2006_v15, %v754_v24  ;;  %v883_v29 = vadd.f32 %v2006_v15, %v882_v25 }
  0xfa   : > { %v756_v30 = vpop.f32.mrf.mxu0  ;;  %v884_v31 = vpop.f32.mrf.mxu1 }
  0xfb   : > { %1327 = vst.msk [vmem:[%s2014_s18] sm:$0xf] %vm1326_vm3, %v1631_v26  ;;  %1359 = vst.msk [vmem:[%s2014_s18 + $0x80] sm:$0xf] %vm1326_vm3, %v1663_v27  ;;  %v1007_v32 = vmax.f32 %v755_v28, 0.0  ;;  %v1039_v33 = vmax.f32 %v883_v29, 0.0 }
  0xfc   : > { %v759_v34 = vpop.f32.mrf.mxu0  ;;  %v887_v35 = vpop.f32.mrf.mxu1 }
  0xfd   : > { %v1632_v36 = vpack.c.bf16 %v1007_v32, %v1007_v32  ;;  %v1664_v37 = vpack.c.bf16 %v1039_v33, %v1039_v33  ;;  %v760_v38 = vadd.f32 %v2006_v15, %v759_v34  ;;  %v888_v39 = vadd.f32 %v2006_v15, %v887_v35 }
  0xfe   : > { %v761_v40 = vpop.f32.mrf.mxu0  ;;  %v889_v41 = vpop.f32.mrf.mxu1 }
  0xff   : > { %1328 = vst.msk [vmem:[%s2014_s18 + $0x4] sm:$0xf] %vm1326_vm3, %v1632_v36  ;;  %1360 = vst.msk [vmem:[%s2014_s18 + $0x84] sm:$0xf] %vm1326_vm3, %v1664_v37  ;;  %v1008_v42 = vmax.f32 %v760_v38, 0.0  ;;  %v1040_v43 = vmax.f32 %v888_v39, 0.0 }
 0x100   : > { %v762_v44 = vpop.f32.mrf.mxu0  ;;  %v890_v45 = vpop.f32.mrf.mxu1 }
 0x101   : > { %v1633_v46 = vpack.c.bf16 %v1008_v42, %v1008_v42  ;;  %v1665_v47 = vpack.c.bf16 %v1040_v43, %v1040_v43  ;;  %v763_v48 = vadd.f32 %v2006_v15, %v762_v44  ;;  %v891_v49 = vadd.f32 %v2006_v15, %v890_v45 }
 0x102   : > { %v764_v50 = vpop.f32.mrf.mxu0  ;;  %v892_v51 = vpop.f32.mrf.mxu1 }
 0x103   : > { %1329 = vst.msk [vmem:[%s2014_s18 + $0x8] sm:$0xf] %vm1326_vm3, %v1633_v46  ;;  %1361 = vst.msk [vmem:[%s2014_s18 + $0x88] sm:$0xf] %vm1326_vm3, %v1665_v47  ;;  %v1009_v52 = vmax.f32 %v763_v48, 0.0  ;;  %v1041_v53 = vmax.f32 %v891_v49, 0.0 }
 0x104   : > { %v767_v54 = vpop.f32.mrf.mxu0  ;;  %v895_v55 = vpop.f32.mrf.mxu1 }
 0x105   : > { %v1634_v56 = vpack.c.bf16 %v1009_v52, %v1009_v52  ;;  %v1666_v57 = vpack.c.bf16 %v1041_v53, %v1041_v53  ;;  %v768_v58 = vadd.f32 %v2006_v15, %v767_v54  ;;  %v896_v59 = vadd.f32 %v2006_v15, %v895_v55 }
 0x106   : > { %v769_v60 = vpop.f32.mrf.mxu0  ;;  %v897_v61 = vpop.f32.mrf.mxu1 }
 0x107   : > { %1330 = vst.msk [vmem:[%s2014_s18 + $0xc] sm:$0xf] %vm1326_vm3, %v1634_v56  ;;  %1362 = vst.msk [vmem:[%s2014_s18 + $0x8c] sm:$0xf] %vm1326_vm3, %v1666_v57  ;;  %v1010_v62 = vmax.f32 %v768_v58, 0.0  ;;  %v1042_v63 = vmax.f32 %v896_v59, 0.0 }
 0x108   : > { %v770_v0 = vpop.f32.mrf.mxu0  ;;  %v898_v1 = vpop.f32.mrf.mxu1 }
 0x109   : > { %v1635_v2 = vpack.c.bf16 %v1010_v62, %v1010_v62  ;;  %v1667_v3 = vpack.c.bf16 %v1042_v63, %v1042_v63  ;;  %v771_v4 = vadd.f32 %v2006_v15, %v770_v0  ;;  %v899_v5 = vadd.f32 %v2006_v15, %v898_v1 }
 0x10a   : > { %v772_v6 = vpop.f32.mrf.mxu0  ;;  %v900_v7 = vpop.f32.mrf.mxu1 }
 0x10b   : > { %1331 = vst.msk [vmem:[%s2014_s18 + $0x10] sm:$0xf] %vm1326_vm3, %v1635_v2  ;;  %1363 = vst.msk [vmem:[%s2014_s18 + $0x90] sm:$0xf] %vm1326_vm3, %v1667_v3  ;;  %v1011_v8 = vmax.f32 %v771_v4, 0.0  ;;  %v1043_v9 = vmax.f32 %v899_v5, 0.0 }
 0x10c   : > { %v775_v10 = vpop.f32.mrf.mxu0  ;;  %v903_v11 = vpop.f32.mrf.mxu1 }
 0x10d   : > { %v1636_v12 = vpack.c.bf16 %v1011_v8, %v1011_v8  ;;  %v1668_v13 = vpack.c.bf16 %v1043_v9, %v1043_v9  ;;  %v776_v14 = vadd.f32 %v2006_v15, %v775_v10  ;;  %v904_v16 = vadd.f32 %v2006_v15, %v903_v11 }
 0x10e   : > { %v777_v17 = vpop.f32.mrf.mxu0  ;;  %v905_v18 = vpop.f32.mrf.mxu1 }
 0x10f   : > { %1332 = vst.msk [vmem:[%s2014_s18 + $0x14] sm:$0xf] %vm1326_vm3, %v1636_v12  ;;  %1364 = vst.msk [vmem:[%s2014_s18 + $0x94] sm:$0xf] %vm1326_vm3, %v1668_v13  ;;  %v1012_v19 = vmax.f32 %v776_v14, 0.0  ;;  %v1044_v20 = vmax.f32 %v904_v16, 0.0 }
 0x110   : > { %v778_v21 = vpop.f32.mrf.mxu0  ;;  %v906_v22 = vpop.f32.mrf.mxu1 }
 0x111   : > { %v1637_v23 = vpack.c.bf16 %v1012_v19, %v1012_v19  ;;  %v1669_v24 = vpack.c.bf16 %v1044_v20, %v1044_v20  ;;  %v779_v25 = vadd.f32 %v2006_v15, %v778_v21  ;;  %v907_v26 = vadd.f32 %v2006_v15, %v906_v22 }
 0x112   : > { %v780_v27 = vpop.f32.mrf.mxu0  ;;  %v908_v28 = vpop.f32.mrf.mxu1 }
 0x113   : > { %1333 = vst.msk [vmem:[%s2014_s18 + $0x18] sm:$0xf] %vm1326_vm3, %v1637_v23  ;;  %1365 = vst.msk [vmem:[%s2014_s18 + $0x98] sm:$0xf] %vm1326_vm3, %v1669_v24  ;;  %v1013_v29 = vmax.f32 %v779_v25, 0.0  ;;  %v1045_v30 = vmax.f32 %v907_v26, 0.0 }
 0x114   : > { %v783_v31 = vpop.f32.mrf.mxu0  ;;  %v911_v32 = vpop.f32.mrf.mxu1 }
 0x115   : > { %v1638_v33 = vpack.c.bf16 %v1013_v29, %v1013_v29  ;;  %v1670_v34 = vpack.c.bf16 %v1045_v30, %v1045_v30  ;;  %v784_v35 = vadd.f32 %v2006_v15, %v783_v31  ;;  %v912_v36 = vadd.f32 %v2006_v15, %v911_v32 }
 0x116   : > { %v785_v37 = vpop.f32.mrf.mxu0  ;;  %v913_v38 = vpop.f32.mrf.mxu1 }
 0x117   : > { %1334 = vst.msk [vmem:[%s2014_s18 + $0x1c] sm:$0xf] %vm1326_vm3, %v1638_v33  ;;  %1366 = vst.msk [vmem:[%s2014_s18 + $0x9c] sm:$0xf] %vm1326_vm3, %v1670_v34  ;;  %v1014_v39 = vmax.f32 %v784_v35, 0.0  ;;  %v1046_v40 = vmax.f32 %v912_v36, 0.0 }
 0x118   : > { %v786_v41 = vpop.f32.mrf.mxu0  ;;  %v914_v42 = vpop.f32.mrf.mxu1 }
 0x119   : > { %v1639_v43 = vpack.c.bf16 %v1014_v39, %v1014_v39  ;;  %v1671_v44 = vpack.c.bf16 %v1046_v40, %v1046_v40  ;;  %v787_v45 = vadd.f32 %v2006_v15, %v786_v41  ;;  %v915_v46 = vadd.f32 %v2006_v15, %v914_v42 }
 0x11a   : > { %v788_v47 = vpop.f32.mrf.mxu0  ;;  %v916_v48 = vpop.f32.mrf.mxu1 }
 0x11b   : > { %1335 = vst.msk [vmem:[%s2014_s18 + $0x20] sm:$0xf] %vm1326_vm3, %v1639_v43  ;;  %1367 = vst.msk [vmem:[%s2014_s18 + $0xa0] sm:$0xf] %vm1326_vm3, %v1671_v44  ;;  %v1015_v49 = vmax.f32 %v787_v45, 0.0  ;;  %v1047_v50 = vmax.f32 %v915_v46, 0.0 }
 0x11c   : > { %v791_v51 = vpop.f32.mrf.mxu0  ;;  %v919_v52 = vpop.f32.mrf.mxu1 }
 0x11d   : > { %v1640_v53 = vpack.c.bf16 %v1015_v49, %v1015_v49  ;;  %v1672_v54 = vpack.c.bf16 %v1047_v50, %v1047_v50  ;;  %v792_v55 = vadd.f32 %v2006_v15, %v791_v51  ;;  %v920_v56 = vadd.f32 %v2006_v15, %v919_v52 }
 0x11e   : > { %v793_v57 = vpop.f32.mrf.mxu0  ;;  %v921_v58 = vpop.f32.mrf.mxu1 }
 0x11f   : > { %1336 = vst.msk [vmem:[%s2014_s18 + $0x24] sm:$0xf] %vm1326_vm3, %v1640_v53  ;;  %1368 = vst.msk [vmem:[%s2014_s18 + $0xa4] sm:$0xf] %vm1326_vm3, %v1672_v54  ;;  %v1016_v59 = vmax.f32 %v792_v55, 0.0  ;;  %v1048_v60 = vmax.f32 %v920_v56, 0.0 }
 0x120   : > { %v794_v61 = vpop.f32.mrf.mxu0  ;;  %v922_v62 = vpop.f32.mrf.mxu1 }
 0x121   : > { %v1641_v63 = vpack.c.bf16 %v1016_v59, %v1016_v59  ;;  %v1673_v0 = vpack.c.bf16 %v1048_v60, %v1048_v60  ;;  %v795_v1 = vadd.f32 %v2006_v15, %v794_v61  ;;  %v923_v2 = vadd.f32 %v2006_v15, %v922_v62 }
 0x122   : > { %v796_v3 = vpop.f32.mrf.mxu0  ;;  %v924_v4 = vpop.f32.mrf.mxu1 }
 0x123   : > { %1337 = vst.msk [vmem:[%s2014_s18 + $0x28] sm:$0xf] %vm1326_vm3, %v1641_v63  ;;  %1369 = vst.msk [vmem:[%s2014_s18 + $0xa8] sm:$0xf] %vm1326_vm3, %v1673_v0  ;;  %v1017_v5 = vmax.f32 %v795_v1, 0.0  ;;  %v1049_v6 = vmax.f32 %v923_v2, 0.0 }
 0x124   : > { %v799_v7 = vpop.f32.mrf.mxu0  ;;  %v927_v8 = vpop.f32.mrf.mxu1 }
 0x125   : > { %v1642_v9 = vpack.c.bf16 %v1017_v5, %v1017_v5  ;;  %v1674_v10 = vpack.c.bf16 %v1049_v6, %v1049_v6  ;;  %v800_v11 = vadd.f32 %v2006_v15, %v799_v7  ;;  %v928_v12 = vadd.f32 %v2006_v15, %v927_v8 }
 0x126   : > { %v801_v13 = vpop.f32.mrf.mxu0  ;;  %v929_v14 = vpop.f32.mrf.mxu1 }
 0x127   : > { %1338 = vst.msk [vmem:[%s2014_s18 + $0x2c] sm:$0xf] %vm1326_vm3, %v1642_v9  ;;  %1370 = vst.msk [vmem:[%s2014_s18 + $0xac] sm:$0xf] %vm1326_vm3, %v1674_v10  ;;  %v1018_v16 = vmax.f32 %v800_v11, 0.0  ;;  %v1050_v17 = vmax.f32 %v928_v12, 0.0 }
 0x128   : > { %v802_v18 = vpop.f32.mrf.mxu0  ;;  %v930_v19 = vpop.f32.mrf.mxu1 }
 0x129   : > { %v1643_v20 = vpack.c.bf16 %v1018_v16, %v1018_v16  ;;  %v1675_v21 = vpack.c.bf16 %v1050_v17, %v1050_v17  ;;  %v803_v22 = vadd.f32 %v2006_v15, %v802_v18  ;;  %v931_v23 = vadd.f32 %v2006_v15, %v930_v19 }
 0x12a   : > { %v804_v24 = vpop.f32.mrf.mxu0  ;;  %v932_v25 = vpop.f32.mrf.mxu1 }
 0x12b   : > { %1339 = vst.msk [vmem:[%s2014_s18 + $0x30] sm:$0xf] %vm1326_vm3, %v1643_v20  ;;  %1371 = vst.msk [vmem:[%s2014_s18 + $0xb0] sm:$0xf] %vm1326_vm3, %v1675_v21  ;;  %v1019_v26 = vmax.f32 %v803_v22, 0.0  ;;  %v1051_v27 = vmax.f32 %v931_v23, 0.0 }
 0x12c   : > { %v807_v28 = vpop.f32.mrf.mxu0  ;;  %v935_v29 = vpop.f32.mrf.mxu1 }
 0x12d   : > { %v1644_v30 = vpack.c.bf16 %v1019_v26, %v1019_v26  ;;  %v1676_v31 = vpack.c.bf16 %v1051_v27, %v1051_v27  ;;  %v808_v32 = vadd.f32 %v2006_v15, %v807_v28  ;;  %v936_v33 = vadd.f32 %v2006_v15, %v935_v29 }
 0x12e   : > { %v809_v34 = vpop.f32.mrf.mxu0  ;;  %v937_v35 = vpop.f32.mrf.mxu1 }
 0x12f   : > { %1340 = vst.msk [vmem:[%s2014_s18 + $0x34] sm:$0xf] %vm1326_vm3, %v1644_v30  ;;  %1372 = vst.msk [vmem:[%s2014_s18 + $0xb4] sm:$0xf] %vm1326_vm3, %v1676_v31  ;;  %v1020_v36 = vmax.f32 %v808_v32, 0.0  ;;  %v1052_v37 = vmax.f32 %v936_v33, 0.0 }
 0x130   : > { %v810_v38 = vpop.f32.mrf.mxu0  ;;  %v938_v39 = vpop.f32.mrf.mxu1 }
 0x131   : > { %v1645_v40 = vpack.c.bf16 %v1020_v36, %v1020_v36  ;;  %v1677_v41 = vpack.c.bf16 %v1052_v37, %v1052_v37  ;;  %v811_v42 = vadd.f32 %v2006_v15, %v810_v38  ;;  %v939_v43 = vadd.f32 %v2006_v15, %v938_v39 }
 0x132   : > { %v812_v44 = vpop.f32.mrf.mxu0  ;;  %v940_v45 = vpop.f32.mrf.mxu1 }
 0x133   : > { %1341 = vst.msk [vmem:[%s2014_s18 + $0x38] sm:$0xf] %vm1326_vm3, %v1645_v40  ;;  %1373 = vst.msk [vmem:[%s2014_s18 + $0xb8] sm:$0xf] %vm1326_vm3, %v1677_v41  ;;  %v1021_v46 = vmax.f32 %v811_v42, 0.0  ;;  %v1053_v47 = vmax.f32 %v939_v43, 0.0 }
 0x134   : > { %v815_v48 = vpop.f32.mrf.mxu0  ;;  %v943_v49 = vpop.f32.mrf.mxu1 }
 0x135   : > { %v1646_v50 = vpack.c.bf16 %v1021_v46, %v1021_v46  ;;  %v1678_v51 = vpack.c.bf16 %v1053_v47, %v1053_v47  ;;  %v816_v52 = vadd.f32 %v2006_v15, %v815_v48  ;;  %v944_v53 = vadd.f32 %v2006_v15, %v943_v49 }
 0x136   : > { %v817_v54 = vpop.f32.mrf.mxu0  ;;  %v945_v55 = vpop.f32.mrf.mxu1 }
 0x137   : > { %1342 = vst.msk [vmem:[%s2014_s18 + $0x3c] sm:$0xf] %vm1326_vm3, %v1646_v50  ;;  %1374 = vst.msk [vmem:[%s2014_s18 + $0xbc] sm:$0xf] %vm1326_vm3, %v1678_v51  ;;  %v1022_v56 = vmax.f32 %v816_v52, 0.0  ;;  %v1054_v57 = vmax.f32 %v944_v53, 0.0 }
 0x138   : > { %v818_v58 = vpop.f32.mrf.mxu0  ;;  %v946_v59 = vpop.f32.mrf.mxu1 }
 0x139   : > { %v1647_v60 = vpack.c.bf16 %v1022_v56, %v1022_v56  ;;  %v1679_v61 = vpack.c.bf16 %v1054_v57, %v1054_v57  ;;  %v819_v62 = vadd.f32 %v2006_v15, %v818_v58  ;;  %v947_v63 = vadd.f32 %v2006_v15, %v946_v59 }
 0x13a   : > { %v820_v0 = vpop.f32.mrf.mxu0  ;;  %v948_v1 = vpop.f32.mrf.mxu1 }
 0x13b   : > { %1343 = vst.msk [vmem:[%s2014_s18 + $0x40] sm:$0xf] %vm1326_vm3, %v1647_v60  ;;  %1375 = vst.msk [vmem:[%s2014_s18 + $0xc0] sm:$0xf] %vm1326_vm3, %v1679_v61  ;;  %v1023_v2 = vmax.f32 %v819_v62, 0.0  ;;  %v1055_v3 = vmax.f32 %v947_v63, 0.0 }
 0x13c   : > { %v823_v4 = vpop.f32.mrf.mxu0  ;;  %v951_v5 = vpop.f32.mrf.mxu1 }
 0x13d   : > { %v1648_v6 = vpack.c.bf16 %v1023_v2, %v1023_v2  ;;  %v1680_v7 = vpack.c.bf16 %v1055_v3, %v1055_v3  ;;  %v824_v8 = vadd.f32 %v2006_v15, %v823_v4  ;;  %v952_v9 = vadd.f32 %v2006_v15, %v951_v5 }
 0x13e   : > { %v825_v10 = vpop.f32.mrf.mxu0  ;;  %v953_v11 = vpop.f32.mrf.mxu1 }
 0x13f   : > { %1344 = vst.msk [vmem:[%s2014_s18 + $0x44] sm:$0xf] %vm1326_vm3, %v1648_v6  ;;  %1376 = vst.msk [vmem:[%s2014_s18 + $0xc4] sm:$0xf] %vm1326_vm3, %v1680_v7  ;;  %v1024_v12 = vmax.f32 %v824_v8, 0.0  ;;  %v1056_v13 = vmax.f32 %v952_v9, 0.0 }
 0x140   : > { %v826_v14 = vpop.f32.mrf.mxu0  ;;  %v954_v16 = vpop.f32.mrf.mxu1 }
 0x141   : > { %v1649_v17 = vpack.c.bf16 %v1024_v12, %v1024_v12  ;;  %v1681_v18 = vpack.c.bf16 %v1056_v13, %v1056_v13  ;;  %v827_v19 = vadd.f32 %v2006_v15, %v826_v14  ;;  %v955_v20 = vadd.f32 %v2006_v15, %v954_v16 }
 0x142   : > { %v828_v21 = vpop.f32.mrf.mxu0  ;;  %v956_v22 = vpop.f32.mrf.mxu1 }
 0x143   : > { %1345 = vst.msk [vmem:[%s2014_s18 + $0x48] sm:$0xf] %vm1326_vm3, %v1649_v17  ;;  %1377 = vst.msk [vmem:[%s2014_s18 + $0xc8] sm:$0xf] %vm1326_vm3, %v1681_v18  ;;  %v1025_v23 = vmax.f32 %v827_v19, 0.0  ;;  %v1057_v24 = vmax.f32 %v955_v20, 0.0 }
 0x144   : > { %v831_v25 = vpop.f32.mrf.mxu0  ;;  %v959_v26 = vpop.f32.mrf.mxu1 }
 0x145   : > { %v1650_v27 = vpack.c.bf16 %v1025_v23, %v1025_v23  ;;  %v1682_v28 = vpack.c.bf16 %v1057_v24, %v1057_v24  ;;  %v832_v29 = vadd.f32 %v2006_v15, %v831_v25  ;;  %v960_v30 = vadd.f32 %v2006_v15, %v959_v26 }
 0x146   : > { %v833_v31 = vpop.f32.mrf.mxu0  ;;  %v961_v32 = vpop.f32.mrf.mxu1 }
 0x147   : > { %1346 = vst.msk [vmem:[%s2014_s18 + $0x4c] sm:$0xf] %vm1326_vm3, %v1650_v27  ;;  %1378 = vst.msk [vmem:[%s2014_s18 + $0xcc] sm:$0xf] %vm1326_vm3, %v1682_v28  ;;  %v1026_v33 = vmax.f32 %v832_v29, 0.0  ;;  %v1058_v34 = vmax.f32 %v960_v30, 0.0 }
 0x148   : > { %v834_v35 = vpop.f32.mrf.mxu0  ;;  %v962_v36 = vpop.f32.mrf.mxu1 }
 0x149   : > { %v1651_v37 = vpack.c.bf16 %v1026_v33, %v1026_v33  ;;  %v1683_v38 = vpack.c.bf16 %v1058_v34, %v1058_v34  ;;  %v835_v39 = vadd.f32 %v2006_v15, %v834_v35  ;;  %v963_v40 = vadd.f32 %v2006_v15, %v962_v36 }
 0x14a   : > { %v836_v41 = vpop.f32.mrf.mxu0  ;;  %v964_v42 = vpop.f32.mrf.mxu1 }
 0x14b   : > { %1347 = vst.msk [vmem:[%s2014_s18 + $0x50] sm:$0xf] %vm1326_vm3, %v1651_v37  ;;  %1379 = vst.msk [vmem:[%s2014_s18 + $0xd0] sm:$0xf] %vm1326_vm3, %v1683_v38  ;;  %v1027_v43 = vmax.f32 %v835_v39, 0.0  ;;  %v1059_v44 = vmax.f32 %v963_v40, 0.0 }
 0x14c   : > { %v839_v45 = vpop.f32.mrf.mxu0  ;;  %v967_v46 = vpop.f32.mrf.mxu1 }
 0x14d   : > { %v1652_v47 = vpack.c.bf16 %v1027_v43, %v1027_v43  ;;  %v1684_v48 = vpack.c.bf16 %v1059_v44, %v1059_v44  ;;  %v840_v49 = vadd.f32 %v2006_v15, %v839_v45  ;;  %v968_v50 = vadd.f32 %v2006_v15, %v967_v46 }
 0x14e   : > { %v841_v51 = vpop.f32.mrf.mxu0  ;;  %v969_v52 = vpop.f32.mrf.mxu1 }
 0x14f   : > { %1348 = vst.msk [vmem:[%s2014_s18 + $0x54] sm:$0xf] %vm1326_vm3, %v1652_v47  ;;  %1380 = vst.msk [vmem:[%s2014_s18 + $0xd4] sm:$0xf] %vm1326_vm3, %v1684_v48  ;;  %v1028_v53 = vmax.f32 %v840_v49, 0.0  ;;  %v1060_v54 = vmax.f32 %v968_v50, 0.0 }
 0x150   : > { %v842_v55 = vpop.f32.mrf.mxu0  ;;  %v970_v56 = vpop.f32.mrf.mxu1 }
 0x151   : > { %v1653_v57 = vpack.c.bf16 %v1028_v53, %v1028_v53  ;;  %v1685_v58 = vpack.c.bf16 %v1060_v54, %v1060_v54  ;;  %v843_v59 = vadd.f32 %v2006_v15, %v842_v55  ;;  %v971_v60 = vadd.f32 %v2006_v15, %v970_v56 }
 0x152   : > { %v844_v61 = vpop.f32.mrf.mxu0  ;;  %v972_v62 = vpop.f32.mrf.mxu1 }
 0x153   : > { %1349 = vst.msk [vmem:[%s2014_s18 + $0x58] sm:$0xf] %vm1326_vm3, %v1653_v57  ;;  %1381 = vst.msk [vmem:[%s2014_s18 + $0xd8] sm:$0xf] %vm1326_vm3, %v1685_v58  ;;  %v1029_v63 = vmax.f32 %v843_v59, 0.0  ;;  %v1061_v0 = vmax.f32 %v971_v60, 0.0 }
 0x154   : > { %v847_v1 = vpop.f32.mrf.mxu0  ;;  %v975_v2 = vpop.f32.mrf.mxu1 }
 0x155   : > { %v1654_v3 = vpack.c.bf16 %v1029_v63, %v1029_v63  ;;  %v1686_v4 = vpack.c.bf16 %v1061_v0, %v1061_v0  ;;  %v848_v5 = vadd.f32 %v2006_v15, %v847_v1  ;;  %v976_v6 = vadd.f32 %v2006_v15, %v975_v2 }
 0x156   : > { %v849_v7 = vpop.f32.mrf.mxu0  ;;  %v977_v8 = vpop.f32.mrf.mxu1 }
 0x157   : > { %1350 = vst.msk [vmem:[%s2014_s18 + $0x5c] sm:$0xf] %vm1326_vm3, %v1654_v3  ;;  %1382 = vst.msk [vmem:[%s2014_s18 + $0xdc] sm:$0xf] %vm1326_vm3, %v1686_v4  ;;  %v1030_v9 = vmax.f32 %v848_v5, 0.0  ;;  %v1062_v10 = vmax.f32 %v976_v6, 0.0 }
 0x158   : > { %v850_v11 = vpop.f32.mrf.mxu0  ;;  %v978_v12 = vpop.f32.mrf.mxu1 }
 0x159   : > { %v1655_v13 = vpack.c.bf16 %v1030_v9, %v1030_v9  ;;  %v1687_v14 = vpack.c.bf16 %v1062_v10, %v1062_v10  ;;  %v851_v16 = vadd.f32 %v2006_v15, %v850_v11  ;;  %v979_v17 = vadd.f32 %v2006_v15, %v978_v12 }
 0x15a   : > { %v852_v18 = vpop.f32.mrf.mxu0  ;;  %v980_v19 = vpop.f32.mrf.mxu1 }
 0x15b   : > { %1351 = vst.msk [vmem:[%s2014_s18 + $0x60] sm:$0xf] %vm1326_vm3, %v1655_v13  ;;  %1383 = vst.msk [vmem:[%s2014_s18 + $0xe0] sm:$0xf] %vm1326_vm3, %v1687_v14  ;;  %v1031_v20 = vmax.f32 %v851_v16, 0.0  ;;  %v1063_v21 = vmax.f32 %v979_v17, 0.0 }
 0x15c   : > { %v855_v22 = vpop.f32.mrf.mxu0  ;;  %v983_v23 = vpop.f32.mrf.mxu1 }
 0x15d   : > { %v1656_v24 = vpack.c.bf16 %v1031_v20, %v1031_v20  ;;  %v1688_v25 = vpack.c.bf16 %v1063_v21, %v1063_v21  ;;  %v856_v26 = vadd.f32 %v2006_v15, %v855_v22  ;;  %v984_v27 = vadd.f32 %v2006_v15, %v983_v23 }
 0x15e   : > { %v857_v28 = vpop.f32.mrf.mxu0  ;;  %v985_v29 = vpop.f32.mrf.mxu1 }
 0x15f   : > { %1352 = vst.msk [vmem:[%s2014_s18 + $0x64] sm:$0xf] %vm1326_vm3, %v1656_v24  ;;  %1384 = vst.msk [vmem:[%s2014_s18 + $0xe4] sm:$0xf] %vm1326_vm3, %v1688_v25  ;;  %v1032_v30 = vmax.f32 %v856_v26, 0.0  ;;  %v1064_v31 = vmax.f32 %v984_v27, 0.0 }
 0x160   : > { %v858_v32 = vpop.f32.mrf.mxu0  ;;  %v986_v33 = vpop.f32.mrf.mxu1 }
 0x161   : > { %v1657_v34 = vpack.c.bf16 %v1032_v30, %v1032_v30  ;;  %v1689_v35 = vpack.c.bf16 %v1064_v31, %v1064_v31  ;;  %v859_v36 = vadd.f32 %v2006_v15, %v858_v32  ;;  %v987_v37 = vadd.f32 %v2006_v15, %v986_v33 }
 0x162   : > { %v860_v38 = vpop.f32.mrf.mxu0  ;;  %v988_v39 = vpop.f32.mrf.mxu1 }
 0x163   : > { %1353 = vst.msk [vmem:[%s2014_s18 + $0x68] sm:$0xf] %vm1326_vm3, %v1657_v34  ;;  %1385 = vst.msk [vmem:[%s2014_s18 + $0xe8] sm:$0xf] %vm1326_vm3, %v1689_v35  ;;  %v1033_v40 = vmax.f32 %v859_v36, 0.0  ;;  %v1065_v41 = vmax.f32 %v987_v37, 0.0 }
 0x164   : > { %v863_v42 = vpop.f32.mrf.mxu0  ;;  %v991_v43 = vpop.f32.mrf.mxu1 }
 0x165   : > { %v1658_v44 = vpack.c.bf16 %v1033_v40, %v1033_v40  ;;  %v1690_v45 = vpack.c.bf16 %v1065_v41, %v1065_v41  ;;  %v864_v46 = vadd.f32 %v2006_v15, %v863_v42  ;;  %v992_v47 = vadd.f32 %v2006_v15, %v991_v43 }
 0x166   : > { %v865_v48 = vpop.f32.mrf.mxu0  ;;  %v993_v49 = vpop.f32.mrf.mxu1 }
 0x167   : > { %1354 = vst.msk [vmem:[%s2014_s18 + $0x6c] sm:$0xf] %vm1326_vm3, %v1658_v44  ;;  %1386 = vst.msk [vmem:[%s2014_s18 + $0xec] sm:$0xf] %vm1326_vm3, %v1690_v45  ;;  %v1034_v50 = vmax.f32 %v864_v46, 0.0  ;;  %v1066_v51 = vmax.f32 %v992_v47, 0.0 }
 0x168   : > { %v866_v52 = vpop.f32.mrf.mxu0  ;;  %v994_v53 = vpop.f32.mrf.mxu1 }
 0x169   : > { %v1659_v54 = vpack.c.bf16 %v1034_v50, %v1034_v50  ;;  %v1691_v55 = vpack.c.bf16 %v1066_v51, %v1066_v51  ;;  %v867_v56 = vadd.f32 %v2006_v15, %v866_v52  ;;  %v995_v57 = vadd.f32 %v2006_v15, %v994_v53 }
 0x16a   : > { %v868_v58 = vpop.f32.mrf.mxu0  ;;  %v996_v59 = vpop.f32.mrf.mxu1 }
 0x16b   : > { %1355 = vst.msk [vmem:[%s2014_s18 + $0x70] sm:$0xf] %vm1326_vm3, %v1659_v54  ;;  %1387 = vst.msk [vmem:[%s2014_s18 + $0xf0] sm:$0xf] %vm1326_vm3, %v1691_v55  ;;  %v1035_v60 = vmax.f32 %v867_v56, 0.0  ;;  %v1067_v61 = vmax.f32 %v995_v57, 0.0 }
 0x16c   : > { %v871_v62 = vpop.f32.mrf.mxu0  ;;  %v999_v63 = vpop.f32.mrf.mxu1 }
 0x16d   : > { %v1660_v0 = vpack.c.bf16 %v1035_v60, %v1035_v60  ;;  %v1692_v1 = vpack.c.bf16 %v1067_v61, %v1067_v61  ;;  %v872_v2 = vadd.f32 %v2006_v15, %v871_v62  ;;  %v1000_v3 = vadd.f32 %v2006_v15, %v999_v63 }
 0x16e   : > { %v873_v4 = vpop.f32.mrf.mxu0  ;;  %v1001_v5 = vpop.f32.mrf.mxu1 }
 0x16f   : > { %1356 = vst.msk [vmem:[%s2014_s18 + $0x74] sm:$0xf] %vm1326_vm3, %v1660_v0  ;;  %1388 = vst.msk [vmem:[%s2014_s18 + $0xf4] sm:$0xf] %vm1326_vm3, %v1692_v1  ;;  %v1036_v6 = vmax.f32 %v872_v2, 0.0  ;;  %v1068_v7 = vmax.f32 %v1000_v3, 0.0 }
 0x170   : > { %v874_v8 = vpop.f32.mrf.mxu0  ;;  %v1002_v9 = vpop.f32.mrf.mxu1 }
 0x171   : > { %v1661_v10 = vpack.c.bf16 %v1036_v6, %v1036_v6  ;;  %v1693_v11 = vpack.c.bf16 %v1068_v7, %v1068_v7  ;;  %v875_v12 = vadd.f32 %v2006_v15, %v874_v8  ;;  %v1003_v13 = vadd.f32 %v2006_v15, %v1002_v9 }
 0x172   : > { %v876_v14 = vpop.f32.mrf.mxu0  ;;  %v1004_v16 = vpop.f32.mrf.mxu1 }
 0x173   : > { %1357 = vst.msk [vmem:[%s2014_s18 + $0x78] sm:$0xf] %vm1326_vm3, %v1661_v10  ;;  %1389 = vst.msk [vmem:[%s2014_s18 + $0xf8] sm:$0xf] %vm1326_vm3, %v1693_v11  ;;  %v1037_v17 = vmax.f32 %v875_v12, 0.0  ;;  %v1069_v18 = vmax.f32 %v1003_v13, 0.0 }
 0x175   : > { %v1662_v19 = vpack.c.bf16 %v1037_v17, %v1037_v17  ;;  %v1694_v20 = vpack.c.bf16 %v1069_v18, %v1069_v18 }
 0x177   : > { %1358 = vst.msk [vmem:[%s2014_s18 + $0x7c] sm:$0xf] %vm1326_vm3, %v1662_v19  ;;  %1390 = vst.msk [vmem:[%s2014_s18 + $0xfc] sm:$0xf] %vm1326_vm3, %v1694_v20 }
 0x178 PF: > { %s13_s12 = sadd.s32 1, %s1837_s12  }
 0x179   : > { %p10_p4 = scmp.ge.s32.totalorder %s13_s12, 6  }
 0x17b   :  { %12 = sbr.rel (!%p10_p4) target bundleno = 1 (0x1), region = 62 }

</bundles_post_ra>
